<compile_context>
chip_gen: v7x
topology: tpu7x:2x2x1
jax: 0.10.0
libtpu: 0.0.40
codegen_flags: <defaults>
</compile_context>

<pallas_src>
import jax
import jax.numpy as jnp
from jax.experimental import pallas as pl
from jax.experimental.pallas import tpu as pltpu


def _maxsim_scores_kernel(a_ref, p_ref, n_ref, score_ref):
    """One grid step = `bb` batch rows.

    For each row b in the block, emits K = 1+N scores:
        score[b, k] = mean_j max_i <a_hat_{b,i}, o_hat_{b,k,j}>
    where o_{b,0} is the positive and o_{b,1..N} are the negatives.  This
    matches torch's max(dim=-2) over anchor tokens then mean(dim=-1) over the
    other sample's tokens.
    """
    bb, T, D = a_ref.shape
    N = n_ref.shape[1]
    K = N + 1
    eps2 = jnp.float32(1e-24)  # (1e-12)^2 -> matches F.normalize eps clamp

    def l2norm(x):
        ss = jnp.sum(x * x, axis=-1, keepdims=True)
        return x * jax.lax.rsqrt(jnp.maximum(ss, eps2))

    # Anchor rows: normalized exactly once per batch row.
    a = l2norm(a_ref[...].astype(jnp.float32))                        # (bb, T, D)

    # Stack positive + negatives along the token (sublane) axis inside VMEM
    # (no HBM concat) and normalize them in one pass.
    others = jnp.concatenate(
        [p_ref[...].astype(jnp.float32),                              # (bb, T, D)
         n_ref[...].astype(jnp.float32).reshape(bb, N * T, D)],       # (bb, N*T, D)
        axis=1,
    )                                                                 # (bb, K*T, D)
    others = l2norm(others)

    # Single batched MXU matmul per step:
    #   s[b, k*T + j, i] = <other_{b,k,j}, anchor_{b,i}>.
    s = jnp.einsum("bkd,bid->bki", others, a,
                   preferred_element_type=jnp.float32)                # (bb, K*T, T)

    # torch: max over anchor tokens i (dim=-2), mean over other tokens j (dim=-1).
    mx = jnp.max(s.reshape(bb, K, T, T), axis=-1)                     # (bb, K, T)
    scores = jnp.sum(mx, axis=-1, keepdims=True) * jnp.float32(1.0 / T)   # (bb, K, 1)

    # Lane-dense (bb, K, 128) row write; wrapper reads lane 0.
    score_ref[...] = jnp.broadcast_to(scores, (bb, K, 128))


def _pick_block_b(B, T, D, N, vmem_budget_bytes=8 * 1024 * 1024):
    """Largest divisor of B whose per-step footprint fits the VMEM budget."""
    K = N + 1
    # Double-buffered I/O blocks (anchor + positive + negatives + output).
    io_bytes = 4 * (2 * T * D + N * T * D + K * 128) * 2
    # In-kernel f32 temporaries (a, others, normalized others, scores matrix, ...).
    tmp_bytes = 4 * (T * D + 2 * K * T * D + K * T * T + K * T + K * 128)
    per_row = io_bytes + tmp_bytes
    cap = max(1, vmem_budget_bytes // per_row)
    # Keep >= 2 grid steps when possible so v7x megacore can split batches.
    if B >= 2:
        cap = min(cap, max(1, B // 2))
    bb = 1
    for d in range(1, min(cap, B) + 1):
        if B % d == 0:
            bb = d
    return bb


def maxsim_contrastive_loss(anchor, positive, negative, *, margin=0.5, num_negatives=3):
    """Pallas implementation of MaxSimContrastiveLoss.forward."""
    B, T, D = anchor.shape
    N = num_negatives
    K = N + 1
    neg = negative.reshape(B, N, T, D)  # metadata-only reshape, no HBM copy
    bb = _pick_block_b(B, T, D, N)

    scores_padded = pl.pallas_call(
        _maxsim_scores_kernel,
        out_shape=jax.ShapeDtypeStruct((B, K, 128), jnp.float32),
        grid_spec=pltpu.PrefetchScalarGridSpec(
            num_scalar_prefetch=0,
            grid=(B // bb,),
            in_specs=[
                pl.BlockSpec((bb, T, D), lambda b: (b, 0, 0)),        # anchor
                pl.BlockSpec((bb, T, D), lambda b: (b, 0, 0)),        # positive
                pl.BlockSpec((bb, N, T, D), lambda b: (b, 0, 0, 0)),  # negatives
            ],
            out_specs=pl.BlockSpec((bb, K, 128), lambda b: (b, 0, 0)),
        ),
        compiler_params=pltpu.CompilerParams(
            dimension_semantics=("parallel",),  # lets v7x megacore split batch blocks
        ),
    )(anchor, positive, neg)

    scores = scores_padded[:, :, 0]          # (B, K)
    pos_score = scores[:, :1]                # (B, 1)  == torch positive_score
    neg_score = scores[:, 1:]                # (B, N)  == torch negative_score

    # Final scalar combination (tiny, plain-JAX glue), reproducing torch
    # broadcasting: sim_neg (1, B) vs sim_pos (B, 1) -> (B, B) matrix, mean.
    sim_neg = jnp.sum(jnp.exp(neg_score / margin), axis=1, keepdims=True).T  # (1, B)
    sim_pos = jnp.exp(pos_score / margin)                                    # (B, 1)
    loss = jnp.mean(jnp.log(1.0 + sim_neg / sim_pos))
    return loss


def _reference_loss(anchor, positive, negative, margin, num_negatives):
    """Pure-JAX reference mirroring the PyTorch forward exactly."""
    B, T, D = anchor.shape

    def norm(x):
        return x / jnp.maximum(jnp.linalg.norm(x, axis=-1, keepdims=True), 1e-12)

    a = norm(anchor)                                   # (B, T, D)
    p = norm(positive)                                 # (B, T, D)
    n = norm(negative).reshape(B, num_negatives, T, D)

    ps = jnp.einsum("bid,bjd->bij", a, p)              # (B, T, T), [b,i,j]=a_i.p_j
    pos = jnp.mean(jnp.max(ps, axis=-2), axis=-1, keepdims=True)        # (B, 1)

    ns = jnp.einsum("bid,bnjd->bnij", a, n)            # (B, N, T, T)
    negs = jnp.mean(jnp.max(ns, axis=-2), axis=-1)     # (B, N)

    sim_neg = jnp.sum(jnp.exp(negs / margin), axis=1, keepdims=True).T  # (1, B)
    sim_pos = jnp.exp(pos / margin)                                      # (B, 1)
    return jnp.mean(jnp.log(1.0 + sim_neg / sim_pos))


if __name__ == "__main__":
    B, T, D, N = 2, 8, 32, 3
    margin = 0.5

    key = jax.random.PRNGKey(0)
    ka, kp, kn = jax.random.split(key, 3)
    anchor = jax.random.normal(ka, (B, T, D), dtype=jnp.float32)
    positive = jax.random.normal(kp, (B, T, D), dtype=jnp.float32)
    negative = jax.random.normal(kn, (B * N, T, D), dtype=jnp.float32)

    loss = maxsim_contrastive_loss(
        anchor, positive, negative, margin=margin, num_negatives=N
    )
    loss = jax.block_until_ready(loss)

    ref = _reference_loss(anchor, positive, negative, margin, N)
    assert jnp.allclose(loss, ref, atol=1e-5, rtol=1e-5), (loss, ref)

    print("KERNEL_OK")
</pallas_src>

<mosaic_0001>
module attributes {stable_mosaic.version = 11 : i64} {
  func.func @_maxsim_scores_kernel(%arg0: i32, %arg1: memref<1x8x32xf32, #tpu.memory_space<vmem>>, %arg2: memref<1x8x32xf32, #tpu.memory_space<vmem>>, %arg3: memref<1x3x8x32xf32, #tpu.memory_space<vmem>>, %arg4: memref<1x4x128xf32, #tpu.memory_space<vmem>>) attributes {dimension_semantics = [#tpu.dimension_semantics<parallel>], iteration_bounds = array<i64: 2>, scalar_prefetch = 0 : i64, scratch_operands = 0 : i64, tpu.core_type = #tpu.core_type<tc>, window_params = [{transform_indices = @transform_0, window_bounds = array<i64: 1, 8, 32>}, {transform_indices = @transform_1, window_bounds = array<i64: 1, 8, 32>}, {transform_indices = @transform_2, window_bounds = array<i64: 1, 3, 8, 32>}, {transform_indices = @transform_3, window_bounds = array<i64: 1, 4, 128>}]} {
    %c0 = arith.constant 0 : index
    %c0_0 = arith.constant 0 : index
    %c0_1 = arith.constant 0 : index
    %0 = vector.load %arg1[%c0, %c0_0, %c0_1] : memref<1x8x32xf32, #tpu.memory_space<vmem>>, vector<1x8x32xf32>
    %1 = arith.mulf %0, %0 : vector<1x8x32xf32>
    %cst = arith.constant dense<0.000000e+00> : vector<1x8xf32>
    %2 = vector.multi_reduction <add>, %1, %cst [2] : vector<1x8x32xf32> to vector<1x8xf32>
    %3 = vector.shape_cast %2 : vector<1x8xf32> to vector<1x8x1xf32>
    %cst_2 = arith.constant 1.000000e-24 : f32
    %4 = vector.broadcast %cst_2 : f32 to vector<1x8x1xf32>
    %5 = arith.maximumf %3, %4 : vector<1x8x1xf32>
    %6 = math.rsqrt %5 : vector<1x8x1xf32>
    %7 = vector.broadcast %6 : vector<1x8x1xf32> to vector<1x8x32xf32>
    %8 = arith.mulf %0, %7 : vector<1x8x32xf32>
    %c0_3 = arith.constant 0 : index
    %c0_4 = arith.constant 0 : index
    %c0_5 = arith.constant 0 : index
    %9 = vector.load %arg2[%c0_3, %c0_4, %c0_5] : memref<1x8x32xf32, #tpu.memory_space<vmem>>, vector<1x8x32xf32>
    %c0_6 = arith.constant 0 : index
    %c0_7 = arith.constant 0 : index
    %c0_8 = arith.constant 0 : index
    %c0_9 = arith.constant 0 : index
    %10 = vector.load %arg3[%c0_6, %c0_7, %c0_8, %c0_9] : memref<1x3x8x32xf32, #tpu.memory_space<vmem>>, vector<1x3x8x32xf32>
    %11 = vector.shape_cast %10 : vector<1x3x8x32xf32> to vector<1x24x32xf32>
    %12 = tpu.concatenate %9, %11 in 1 : vector<1x8x32xf32>, vector<1x24x32xf32> -> vector<1x32x32xf32>
    %13 = arith.mulf %12, %12 : vector<1x32x32xf32>
    %cst_10 = arith.constant dense<0.000000e+00> : vector<1x32xf32>
    %14 = vector.multi_reduction <add>, %13, %cst_10 [2] : vector<1x32x32xf32> to vector<1x32xf32>
    %15 = vector.shape_cast %14 : vector<1x32xf32> to vector<1x32x1xf32>
    %cst_11 = arith.constant 1.000000e-24 : f32
    %16 = vector.broadcast %cst_11 : f32 to vector<1x32x1xf32>
    %17 = arith.maximumf %15, %16 : vector<1x32x1xf32>
    %18 = math.rsqrt %17 : vector<1x32x1xf32>
    %19 = vector.broadcast %18 : vector<1x32x1xf32> to vector<1x32x32xf32>
    %20 = arith.mulf %12, %19 : vector<1x32x32xf32>
    "tpu.trace_start"() <{level = 10 : i32, message = "bkd,bid->bki"}> : () -> ()
    %cst_12 = arith.constant dense<0.000000e+00> : vector<1x32x8xf32>
    %21 = tpu.matmul %20, %8, %cst_12 {dimension_numbers = #tpu.dot_dimension_numbers<[2], [2], [1], [1], [0, 0, 0, 1, 1, 1], [0], [0]>} : vector<1x32x32xf32>, vector<1x8x32xf32>, vector<1x32x8xf32> -> vector<1x32x8xf32>
    "tpu.trace_stop"() : () -> ()
    %22 = vector.shape_cast %21 : vector<1x32x8xf32> to vector<1x4x8x8xf32>
    %cst_13 = arith.constant dense<0xFF800000> : vector<1x4x8xf32>
    %23 = vector.multi_reduction <maximumf>, %22, %cst_13 [3] : vector<1x4x8x8xf32> to vector<1x4x8xf32>
    %cst_14 = arith.constant dense<0.000000e+00> : vector<1x4xf32>
    %24 = vector.multi_reduction <add>, %23, %cst_14 [2] : vector<1x4x8xf32> to vector<1x4xf32>
    %25 = vector.shape_cast %24 : vector<1x4xf32> to vector<1x4x1xf32>
    %cst_15 = arith.constant 1.250000e-01 : f32
    %26 = vector.broadcast %cst_15 : f32 to vector<1x4x1xf32>
    %27 = arith.mulf %25, %26 : vector<1x4x1xf32>
    %28 = vector.shape_cast %27 : vector<1x4x1xf32> to vector<1x4x1xf32>
    %29 = vector.broadcast %28 : vector<1x4x1xf32> to vector<1x4x128xf32>
    %c0_16 = arith.constant 0 : index
    %c0_17 = arith.constant 0 : index
    %c0_18 = arith.constant 0 : index
    %30 = vector.load %arg4[%c0_16, %c0_17, %c0_18] : memref<1x4x128xf32, #tpu.memory_space<vmem>>, vector<1x4x128xf32>
    tpu.vector_store %arg4[%c0_16, %c0_17, %c0_18], %29 {strides = array<i32>} : memref<1x4x128xf32, #tpu.memory_space<vmem>>, vector<1x4x128xf32>,
    return
  }
  func.func @transform_0(%arg0: i32) -> (i32, i32, i32) {
    %c0_i32 = arith.constant 0 : i32
    %c0_i32_0 = arith.constant 0 : i32
    %c0_i32_1 = arith.constant 0 : i32
    return %arg0, %c0_i32, %c0_i32_0 : i32, i32, i32
  }
  func.func @transform_1(%arg0: i32) -> (i32, i32, i32) {
    %c0_i32 = arith.constant 0 : i32
    %c0_i32_0 = arith.constant 0 : i32
    %c0_i32_1 = arith.constant 0 : i32
    return %arg0, %c0_i32, %c0_i32_0 : i32, i32, i32
  }
  func.func @transform_2(%arg0: i32) -> (i32, i32, i32, i32) {
    %c0_i32 = arith.constant 0 : i32
    %c0_i32_0 = arith.constant 0 : i32
    %c0_i32_1 = arith.constant 0 : i32
    %c0_i32_2 = arith.constant 0 : i32
    return %arg0, %c0_i32, %c0_i32_0, %c0_i32_1 : i32, i32, i32, i32
  }
  func.func @transform_3(%arg0: i32) -> (i32, i32, i32) {
    %c0_i32 = arith.constant 0 : i32
    %c0_i32_0 = arith.constant 0 : i32
    %c0_i32_1 = arith.constant 0 : i32
    return %arg0, %c0_i32, %c0_i32_0 : i32, i32, i32
  }
}

</mosaic_0001>

<bundles_post_ra>
// kernel: tpu_custom_call.1
= control target key start
LH: loop header
LB: loop body
LE: loop exit
PB: predicated region body
PF: predicated region fallthrough
CT: control target
= control target key end

     0   :  { %s1129_s0 = inlined_call_operand.hbm [shape: f32[2,8,32], index: 0, kind: input, shape index: {}]   ;;  %s1130_s1 = inlined_call_operand.hbm [shape: f32[2,8,32], index: 1, kind: input, shape index: {}]   ;;  %s1131_s2 = inlined_call_operand.hbm [shape: f32[2,3,8,32], index: 2, kind: input, shape index: {}]   ;;  %s1132_s3 = inlined_call_operand.hbm [shape: f32[2,4,128], index: 3, kind: output, shape index: {}]  }
   0x1   :  { %1135 = sst [smem:[#allocation12_spill]] %s1130_s1 }
   0x2   :  { %8 = vsyncpa [#allocation3], 0 }
   0x3   :  { %10 = vsyncpa [#allocation3 + $0x1], 0 }
   0x4   :  { %11 = vsyncpa [#allocation6], 0 }
   0x5   :  { %13 = vsyncpa [#allocation6 + $0x1], 0 }
   0x6   :  { %14 = vsyncpa [#allocation4], 0 }
   0x7   :  { %16 = vsyncpa [#allocation4 + $0x1], 0  ;;  %s871_s12 = smov 0   ;;  %s873_s13 = smov 0  }
   0x8   :  { %s875_s14 = smov 0   ;;  %s877_s15 = smov 0  }
   0x9 LB: > { %s892_s16 = sadd.s32 4294967295, %s843_s15   ;;  %s576_s17 = sadd.s32 4294967294, %s843_s15   ;;  %s843_s15 = sphi %s877_s15, %s1151_s15   ;;  %s839_s14 = sphi %s875_s14, %s1150_s14   ;;  %s835_s13 = sphi %s873_s13, %s1149_s13   ;;  %s831_s12 = sphi %s871_s12, %s1148_s12  }
   0xa   : > { %s896_s18 = sadd.s32 1, %s843_s15   ;;  %s29_s19 = sadd.s32 1, %s839_s14 }
   0xb   : > { %s26_s20 = ssub.s32 %s843_s15, %s896_s18  ;;  %p36_p0 = scmp.ne.s32.totalorder %s839_s14, %s835_s13 }
   0xc   : > { %p27_p1 = scmp.eq.s32.totalorder %s26_s20, 0  ;;  %p37_p2 = scmp.eq.s32.totalorder %s843_s15, 0 }
   0xd   : > { %p42_p3 = scmp.ne.s32.totalorder %s835_s13, %s831_s12  ;;  %p43_p4 = scmp.eq.s32.totalorder %s892_s16, 0 }
   0xe   : > { %s908_s21 = scalar_select %p27_p1, %s839_s14, %s29_s19  }
   0xf   : > { %p38_p5 = por %p37_p2, %p36_p0  ;;  %p910_p6 = por %p43_p4, %p42_p3 }
  0x10   : > { %p118_p7 = scmp.eq.s32.totalorder %s892_s16, 1  ;;  %p124_p8 = scmp.eq.s32.totalorder %s576_s17, 1 }
  0x11   : > { %s1136_s22 = scalar_select %p910_p6, 1, 0 }
  0x12   : > { %p637_p10 = scmp.lt.s32.totalorder %s843_s15, 2  ;;  %p917_p11 = por %p118_p7, %p36_p0 }
  0x13   : > { %p921_p12 = por %p124_p8, %p42_p3  ;;  %s926_s25 = sand.u32 1, %s839_s14  }
  0x14   : > { %s1137_s23 = scalar_select %p917_p11, 1, 0 }
  0x15   : > { %s1138_s24 = scalar_select %p921_p12, 1, 0 }
  0x16   : > { %s580_s26 = sshll.u32 %s843_s15, 7  ;;  %s579_s27 = sshll.u32 %s926_s25, 3 }
  0x17   : > { %p930_p13 = pnand %p637_p10, %p38_p5  ;;  %s162_s29 = sand.u32 1, %s843_s15  }
  0x18   : > { %s1140_s1 = sld [smem:[#allocation12_spill]]  ;;  %s166_s6 = scalar_lea.vmem [#allocation5], %s579_s27 }
  0x19   : > { %s173_s7 = sshll.u32 %s166_s6, 4  ;;  %s612_s8 = smul.u32 24, %s926_s25  ;;  %s944_s7 = int_to_ptr.vmem [resolvable:$true] %s173_s7 }
  0x1a   : > { %s947_s9 = scalar_lea.sflag [#allocation6], %s162_s29  ;;  %p953_p1 = pneg %p930_p13 }
  0x1e   : > { %s940_s5 = scalar_lea.hbm %s1140_s1, %s580_s26  ;;  %s688_s20 = scalar_lea.hbm %s1140_s1, 256 }
  0x1f   : > { %s683_s10 = scalar_lea.hbm %s940_s5, 128  ;;  %p689_p4 = scmp.lt.u32.totalorder %s940_s5, %s1140_s1 }
  0x20   : > { %p684_p0 = scmp.ne.s32.totalorder %s940_s5, %s683_s10  ;;  %p690_p5 = scmp.lt.u32.totalorder %s688_s20, %s683_s10 }
  0x21   : > { %p692_p8 = scmp.lt.u32.totalorder %s683_s10, %s940_s5 }
  0x22   : > { %p686_p2 = pnand %p953_p1, %p684_p0  ;;  %p691_p7 = por %p690_p5, %p689_p4 }
  0x24   : > { %p687_p3 = pneg %p686_p2  ;;  %p693_p10 = por %p692_p8, %p691_p7 }
  0x26   : > { %p694_p9 = pnand %p693_p10, %p687_p3 }
  0x28   : > { %697 = shalt.err (!%p694_p9)
}
  0x29   : > { %s698_s29 = scalar_lea.vmem %s944_s7, 128  ;;  %s845_s6 = smov [#allocation5]  }
  0x2a   : > { %p699_p0 = scmp.ne.s32.totalorder %s944_s7, %s698_s29  ;;  %s703_s17 = sshll.u32 %s845_s6, 4  ;;  %s704_s17 = int_to_ptr.vmem [resolvable:$false] %s703_s17 }
  0x2b   : > { %s705_s19 = scalar_lea.vmem %s704_s17, 256  ;;  %p706_p11 = scmp.lt.s32.totalorder %s944_s7, %s704_s17 }
  0x2c   : > { %p701_p2 = pnand %p699_p0, %p953_p1  ;;  %p707_p6 = scmp.lt.s32.totalorder %s705_s19, %s698_s29 }
  0x2e   : > { %p702_p12 = pneg %p701_p2  ;;  %p708_p4 = por %p707_p6, %p706_p11 }
  0x30   : > { %p709_p5 = pnand %p708_p4, %p702_p12 }
  0x32   : > { %712 = shalt.err (!%p709_p5)
}
  0x33   : > { %629 = dma.hbm_to_vmem [thread:$0]  (!%p930_p13), %s940_s5, 128, %s944_s7, %s947_s9  }
  0x34   : > { %p584_p9 = scmp.ge.s32.totalorder %s843_s15, 1  ;;  %s184_s10 = scalar_lea.vmem [#allocation7], %s612_s8 }
  0x35   : > { %s191_s20 = sshll.u32 %s184_s10, 4  ;;  %p199_p6 = scmp.lt.s32.totalorder %s843_s15, 3  ;;  %s981_s20 = int_to_ptr.vmem [resolvable:$true] %s191_s20 }
  0x36   : > { %s992_s6 = scalar_lea.hbm %s1129_s0, %s580_s26  ;;  %s148_s5 = scalar_lea.vmem [#allocation2], %s579_s27 }
  0x37   : > { %p983_p11 = pnand %p584_p9, %p199_p6  ;;  %s155_s7 = sshll.u32 %s148_s5, 4  ;;  %s996_s7 = int_to_ptr.vmem [resolvable:$true] %s155_s7 }
  0x38   : > { %s613_s8 = smul.u32 384, %s843_s15  ;;  %s145_s17 = scalar_lea.sflag [#allocation3], %s926_s25 }
  0x39   : > { %s1142_s30 = scalar_select %p983_p11, 1, 0 }
  0x3a   : > { %s713_s19 = scalar_lea.hbm %s992_s6, 128  ;;  %s718_s26 = scalar_lea.hbm %s1129_s0, 256 }
  0x3b   : > { %p714_p12 = scmp.ne.s32.totalorder %s992_s6, %s713_s19  ;;  %p719_p8 = scmp.lt.u32.totalorder %s992_s6, %s1129_s0 }
  0x3c   : > { %p720_p10 = scmp.lt.u32.totalorder %s718_s26, %s713_s19  ;;  %p722_p2 = scmp.lt.u32.totalorder %s713_s19, %s992_s6 }
  0x3d   : > { %p716_p3 = pnand %p714_p12, %p953_p1 }
  0x3e   : > { %p721_p0 = por %p720_p10, %p719_p8 }
  0x3f   : > { %p717_p7 = pneg %p716_p3 }
  0x40   : > { %p723_p4 = por %p722_p2, %p721_p0 }
  0x42   : > { %p724_p5 = pnand %p723_p4, %p717_p7 }
  0x44   : > { %727 = shalt.err (!%p724_p5)
}
  0x45   : > { %s728_s25 = scalar_lea.vmem %s996_s7, 128  ;;  %s846_s27 = smov [#allocation2]  }
  0x46   : > { %p729_p9 = scmp.ne.s32.totalorder %s996_s7, %s728_s25  ;;  %s733_s5 = sshll.u32 %s846_s27, 4  ;;  %s734_s5 = int_to_ptr.vmem [resolvable:$false] %s733_s5 }
  0x47   : > { %s735_s1 = scalar_lea.vmem %s734_s5, 256  ;;  %p736_p3 = scmp.lt.s32.totalorder %s996_s7, %s734_s5 }
  0x48   : > { %p731_p6 = pnand %p729_p9, %p953_p1  ;;  %p737_p11 = scmp.lt.s32.totalorder %s735_s1, %s728_s25 }
  0x4a   : > { %p732_p12 = pneg %p731_p6  ;;  %p738_p8 = por %p737_p11, %p736_p3 }
  0x4c   : > { %p739_p10 = pnand %p738_p8, %p732_p12 }
  0x4e   : > { %742 = shalt.err (!%p739_p10)
}
  0x4f   : > { %626 = dma.hbm_to_vmem [thread:$0]  (!%p930_p13), %s992_s6, 128, %s996_s7, %s145_s17  }
  0x50   : > { %s1026_s4 = scalar_lea.hbm %s1131_s2, %s613_s8  ;;  %s748_s27 = scalar_lea.hbm %s1131_s2, 768 }
  0x51   : > { %s743_s26 = scalar_lea.hbm %s1026_s4, 384  ;;  %p749_p2 = scmp.lt.u32.totalorder %s1026_s4, %s1131_s2 }
  0x52   : > { %p744_p11 = scmp.ne.s32.totalorder %s1026_s4, %s743_s26  ;;  %p750_p4 = scmp.lt.u32.totalorder %s748_s27, %s743_s26 }
  0x53   : > { %p752_p9 = scmp.lt.u32.totalorder %s743_s26, %s1026_s4 }
  0x54   : > { %p746_p7 = pnand %p744_p11, %p953_p1  ;;  %p751_p5 = por %p750_p4, %p749_p2 }
  0x56   : > { %p747_p0 = pneg %p746_p7  ;;  %p753_p6 = por %p752_p9, %p751_p5 }
  0x58   : > { %p754_p12 = pnand %p753_p6, %p747_p0 }
  0x5a   : > { %757 = shalt.err (!%p754_p12)
}
  0x5b   : > { %s758_s8 = scalar_lea.vmem %s981_s20, 384  ;;  %s847_s17 = smov [#allocation7]  }
  0x5c   : > { %p759_p3 = scmp.ne.s32.totalorder %s981_s20, %s758_s8  ;;  %s763_s5 = sshll.u32 %s847_s17, 4  ;;  %s764_s5 = int_to_ptr.vmem [resolvable:$false] %s763_s5 }
  0x5d   : > { %s765_s1 = scalar_lea.vmem %s764_s5, 768  ;;  %p766_p11 = scmp.lt.s32.totalorder %s981_s20, %s764_s5 }
  0x5e   : > { %p761_p8 = pnand %p759_p3, %p953_p1  ;;  %p767_p7 = scmp.lt.s32.totalorder %s765_s1, %s758_s8 }
  0x60   : > { %p762_p10 = pneg %p761_p8  ;;  %p768_p2 = por %p767_p7, %p766_p11 }
  0x62   : > { %p769_p4 = pnand %p768_p2, %p762_p10 }
  0x64   : > { %772 = shalt.err (!%p769_p4)
}
  0x65   : > { %s848_s19 = smov 128   ;;  %s849_s10 = smov 8  }
  0x66   : > { %632 = dma.hbm_to_vmem [thread:$0]  (!%p930_p13), %s1026_s4, 384, %s981_s20, %s947_s9, %s848_s19, %s848_s19, %s849_s10  }
  0x67   : > { %p1143_p1 = scmp.ne.s32.totalorder %s1142_s30, 0 }
  0x68   : > { %s1053_s11 = sand.u32 (!%p1143_p1), 1, %s835_s13   ;;  %p1144_p0 = scmp.ne.s32.totalorder (!%p1143_p1), %s1136_s22, 0 }
  0x69   : > { %203 = sbr.rel (%p1143_p1) target bundleno = 805 (0x325), region = 32  ;;  %s585_s26 = sshll.u32 (!%p1143_p1), %s1053_s11, 3 }
  0x6a   : > { %s206_s29 = scalar_lea.sflag (!%p1143_p1), [#allocation3], %s1053_s11  ;;  %s209_s25 = scalar_lea.vmem (!%p1143_p1), [#allocation2], %s585_s26 }
  0x70   : > { %818 = dma.done.wait (%p1144_p0), %s206_s29, 128  }
  0x71   : > { %820 = vsyncadd (%p1144_p0), %s206_s29, 4294967168  ;;  %s214_s28 = sand.u32 1, %s892_s16   ;;  %s218_s20 = scalar_lea.vmem [#allocation5], %s585_s26 }
  0x72   : > { %s215_s9 = scalar_lea.sflag [#allocation6], %s214_s28 }
  0x73   : > { %822 = dma.done.wait (%p1144_p0), %s215_s9, 512  }
  0x74   : > { %824 = vsyncadd (%p1144_p0), %s215_s9, 4294966784  ;;  %s614_s30 = smul.u32 24, %s1053_s11  ;;  %v260_v0 = vld [vmem:[%s209_s25] sm:$0xff]  ;;  %vm262_vm0 = vcmask 261120   ;;  %v269_v2 = vld [vmem:[%s218_s20] sm:$0xff]  ;;  %vm401_vm1 = vcmask 64512   ;;  %v418_v43 = vlaneseq }
  0x75   : > { %v261_v3 = vmul.f32 %v260_v0, %v260_v0  ;;  %v273_v5 = vmul.f32 %v269_v2, %v269_v2  ;;  %vm436_vm2 = vcmask 1041409   ;;  %vm438_vm3 = vcmask 1042434   ;;  %s587_s22 = sshll.u32 %s1053_s11, 2  ;;  %s594_s27 = sshll.u32 %s892_s16, 6 }
  0x76   : > { %s227_s4 = scalar_lea.vmem [#allocation7], %s614_s30  ;;  %v419_v44 = vand.u32 127, %v418_v43  ;;  %v421_v45 = vshrl.u32 %v418_v43, 7  ;;  %vm440_vm4 = vcmask 1043459   ;;  %vm443_vm5 = vcmask 60416   ;;  %s259_s6 = scalar_lea.vmem [#allocation8], %s587_s22 }
  0x77   : > { %v270_v1 = vld [vmem:[%s227_s4] sm:$0xff]  ;;  %v271_v6 = vld [vmem:[%s227_s4 + $0x8] sm:$0xff]  ;;  %v272_v8 = vld [vmem:[%s227_s4 + $0x10] sm:$0xff]  ;;  %v263_v9 = vsel %vm262_vm0, %v261_v3, 0.0  ;;  %v277_v11 = vsel %vm262_vm0, %v273_v5, 0.0  ;;  %s463_s7 = sshll.u32 %s259_s6, 4  ;;  %s1085_s5 = scalar_lea.hbm %s1132_s3, %s594_s27  ;;  %s1087_s7 = int_to_ptr.vmem [resolvable:$true] %s463_s7 }
  0x78   : > { %v274_v4 = vmul.f32 %v270_v1, %v270_v1  ;;  %v275_v7 = vmul.f32 %v271_v6, %v271_v6  ;;  %264 = vadd.xlane.f32.xlu0 %v263_v9  ;;  %v276_v13 = vmul.f32 %v272_v8, %v272_v8  ;;  %v422_v46 = vsub.s32 %v419_v44, %v421_v45  ;;  %s450_s1 = scalar_lea.sflag [#allocation4], %s1053_s11  ;;  %s773_s19 = scalar_lea.vmem %s1087_s7, 64 }
  0x79   : > { %p774_p13 = scmp.ne.s32.totalorder %s1087_s7, %s773_s19  ;;  %p1145_p5 = scmp.ne.s32.totalorder %s1137_s23, 0 }
  0x7a   : > { %v280_v10 = vsel %vm262_vm0, %v274_v4, 0.0  ;;  %v283_v12 = vsel %vm262_vm0, %v275_v7, 0.0  ;;  %v286_v14 = vsel %vm262_vm0, %v276_v13, 0.0  ;;  %s850_s16 = smov [#allocation8]  }
  0x7b   : > { %281 = vadd.xlane.f32.xlu1 %v280_v10  ;;  %p775_p9 = pnand %p774_p13, %p1145_p5  ;;  %s777_s10 = sshll.u32 %s850_s16, 4  ;;  %s778_s10 = int_to_ptr.vmem [resolvable:$false] %s777_s10 }
  0x7c   : > { %278 = vadd.xlane.f32.xlu0 %v277_v11  ;;  %s779_s26 = scalar_lea.vmem %s778_s10, 128  ;;  %p780_p12 = scmp.lt.s32.totalorder %s1087_s7, %s778_s10 }
  0x7d   : > { %p776_p6 = pneg %p775_p9  ;;  %p781_p3 = scmp.lt.s32.totalorder %s779_s26, %s773_s19 }
  0x7f   : > { %284 = vadd.xlane.f32.xlu1 %v283_v12  ;;  %p782_p8 = por %p781_p3, %p780_p12 }
  0x80   : > { %287 = vadd.xlane.f32.xlu0 %v286_v14 }
  0x81   : > { %p783_p10 = pnand %p782_p8, %p776_p6 }
 0x105   : > { %v265_v15 = vpop.xlane.xlu0 %264 }
 0x106   : > { %v266_v17 = vmax.f32 %v265_v15, 1e-24 }
 0x108   : > { %v282_v16 = vpop.xlane.xlu1 %281  ;;  %673 = vrsqrt.f32 %v266_v17 }
 0x109   : > { %v290_v18 = vmax.f32 %v282_v16, 1e-24  ;;  %v279_v19 = vpop.xlane.xlu0 %278 }
 0x10a   : > { %v289_v21 = vmax.f32 %v279_v19, 1e-24 }
 0x10b   : > { %675 = vrsqrt.f32 %v290_v18 }
 0x10c   : > { %v285_v20 = vpop.xlane.xlu1 %284  ;;  %677 = vrsqrt.f32 %v289_v21 }
 0x10d   : > { %v291_v22 = vmax.f32 %v285_v20, 1e-24  ;;  %v288_v23 = vpop.xlane.xlu0 %287 }
 0x10e   : > { %v292_v24 = vmax.f32 %v288_v23, 1e-24 }
 0x10f   : > { %679 = vrsqrt.f32 %v291_v22 }
 0x110   : > { %681 = vrsqrt.f32 %v292_v24 }
 0x112   : > { %v674_v25 = vpop.eup %673 }
 0x113   : > { %v268_v27 = vmul.f32 %v674_v25, %v260_v0 }
 0x115   : > { %v676_v26 = vpop.eup %675  ;;  %602 = vmatprep.subr.msk.mxu0 %vm262_vm0, %v268_v27  ;;  %610 = vmatprep.subr.msk.mxu1 %vm262_vm0, %v268_v27 }
 0x116   : > { %v678_v28 = vpop.eup %677  ;;  %603 = vmatpush3.xpose.msk.msra.mxu0 %vm262_vm0, %v268_v27  ;;  %611 = vmatpush3.xpose.msk.msra.mxu1 %vm262_vm0, %v268_v27  ;;  %v298_v29 = vmul.f32 %v676_v26, %v270_v1 }
 0x117   : > { %v297_v31 = vmul.f32 %v678_v28, %v269_v2 }
 0x119   : > { %v680_v30 = vpop.eup %679  ;;  %604 = vmatprep.mubr.msk.f32.mxu0 %vm262_vm0, %v297_v31 }
 0x11a   : > { %v299_v32 = vmul.f32 %v680_v30, %v271_v6  ;;  %v682_v33 = vpop.eup %681  ;;  %605 = vmatmul.mubr.msk.f32.vlgmr.msra.gmra.mrb[0].mxu0 %vm262_vm0, %v298_v29 }
 0x11b   : > { %v300_v34 = vmul.f32 %v682_v33, %v272_v8 }
 0x11c   : > { %607 = vmatprep.mubr.msk.f32.mxu1 %vm262_vm0, %v299_v32 }
 0x11d   : > { %608 = vmatmul.mubr.msk.f32.vlgmr.msra.gmra.mrb[0].mxu1 %vm262_vm0, %v300_v34 }
 0x1ed   : > { %v606_v35 = vpop.f32.mrb[0].mxu0 }
 0x1ee   : > { %v382_v36 = vpop.f32.mrb[1].mxu0  ;;  %v405_v37 = vsel %vm401_vm1, %v606_v35, -inf }
 0x1ef   : > { %406 = vmax.xlane.f32.xlu0 %v405_v37  ;;  %v402_v38 = vsel %vm401_vm1, %v382_v36, -inf }
 0x1f0   : > { %403 = vmax.xlane.f32.xlu1 %v402_v38  ;;  %v609_v39 = vpop.f32.mrb[0].mxu1 }
 0x1f1   : > { %v392_v40 = vpop.f32.mrb[1].mxu1  ;;  %v411_v41 = vsel %vm401_vm1, %v609_v39, -inf }
 0x1f2   : > { %v408_v42 = vsel %vm401_vm1, %v392_v40, -inf }
 0x1f3   : > { %412 = vmax.xlane.f32.xlu0 %v411_v41 }
 0x1f4   : > { %409 = vmax.xlane.f32.xlu1 %v408_v42 }
 0x27c   : > { %v407_v47 = vpop.xlane.xlu0 %406 }
 0x27d   : > { %v404_v48 = vpop.xlane.xlu1 %403  ;;  %v427_v49 = vrot.slane %v407_v47, %v422_v46 }
 0x27e   : > { %v423_v50 = vrot.slane %v404_v48, %v422_v46 }
 0x280   : > { %v413_v51 = vpop.xlane.xlu0 %412  ;;  %v437_v54 = vsel %vm436_vm2, %v427_v49, %v423_v50 }
 0x281   : > { %v410_v52 = vpop.xlane.xlu1 %409  ;;  %v435_v55 = vrot.slane %v413_v51, %v422_v46 }
 0x282   : > { %v431_v53 = vrot.slane %v410_v52, %v422_v46 }
 0x284   : > { %v439_v56 = vsel %vm438_vm3, %v431_v53, %v437_v54 }
 0x285   : > { %v441_v57 = vsel %vm440_vm4, %v435_v55, %v439_v56 }
 0x286   : > { %v444_v58 = vsel %vm443_vm5, %v441_v57, 0.0 }
 0x287   : > { %445 = vadd.xlane.f32.xlu1 %v444_v58 }
 0x314   : > { %v446_v59 = vpop.xlane.xlu1 %445 }
 0x315   : > { %v447_v60 = vmul.f32 0.125, %v446_v59 }
 0x317   : > { %448 = vst [vmem:[%s259_s6] sm:$0xf] %v447_v60 }
 0x318   : > { %786 = shalt.err (!%p783_p10)
}
 0x319   : > { %s787_s11 = scalar_lea.hbm %s1085_s5, 64  ;;  %s791_s28 = scalar_lea.hbm %s1132_s3, 128 }
 0x31a   : > { %p788_p11 = scmp.ne.s32.totalorder %s1085_s5, %s787_s11  ;;  %p792_p4 = scmp.lt.u32.totalorder %s1085_s5, %s1132_s3 }
 0x31b   : > { %p793_p1 = scmp.lt.u32.totalorder %s791_s28, %s787_s11  ;;  %p795_p13 = scmp.lt.u32.totalorder %s787_s11, %s1085_s5 }
 0x31c   : > { %p789_p7 = pnand %p788_p11, %p1145_p5 }
 0x31d   : > { %p794_p0 = por %p793_p1, %p792_p4 }
 0x31e   : > { %p790_p2 = pneg %p789_p7 }
 0x31f   : > { %p796_p9 = por %p795_p13, %p794_p0 }
 0x321   : > { %p797_p6 = pnand %p796_p9, %p790_p2 }
 0x323   : > { %800 = shalt.err (!%p797_p6)
}
 0x324   : > { %621 = dma.vmem_to_hbm [thread:$0]  (%p1145_p5), %s1087_s7, 64, %s1085_s5, %s450_s1  }
 0x325 PF: > { %s475_s30 = sand.u32 1, %s831_s12   ;;  %p1146_p12 = scmp.ne.s32.totalorder %s1138_s24, 0 }
 0x326   : > { %p1147_p3 = scmp.ge.s32.totalorder %s843_s15, 2  ;;  %s476_s4 = scalar_lea.sflag [#allocation4], %s475_s30 }
 0x328   : > { %p634_p8 = pnand %p1147_p3, %p1146_p12 }
 0x32a   : > { %826 = dma.done.wait (!%p634_p8), %s476_s4, 64  }
 0x32b   : > { %828 = vsyncadd (!%p634_p8), %s476_s4, 4294967232  ;;  %p19_p10 = scmp.ge.s32.totalorder %s896_s18, 4   ;;  %s1148_s12 = smov %s835_s13 }
 0x32c   : > { %s1149_s13 = smov %s839_s14  ;;  %s1150_s14 = smov %s908_s21 }
 0x32d   : > { %s1151_s15 = smov %s896_s18  ;;  %21 = sbr.rel (!%p19_p10) target bundleno = 9 (0x9), region = 101 }
 0x334   :  { %481 = vsyncpa [#allocation3], 1 }
 0x335   :  { %483 = vsyncpa [#allocation3 + $0x1], 1 }
 0x336   :  { %484 = vsyncpa [#allocation6], 1 }
 0x337   :  { %486 = vsyncpa [#allocation6 + $0x1], 1 }
 0x338   :  { %487 = vsyncpa [#allocation4], 1 }
 0x339   :  { %489 = vsyncpa [#allocation4 + $0x1], 1 }

</bundles_post_ra>
